<compile_context>
chip_gen: v7x
topology: tpu7x:2x2x1
jax: 0.10.0
libtpu: 0.0.40
codegen_flags: <defaults>
</compile_context>

<pallas_src>
import functools
import math

import jax
import jax.numpy as jnp
from jax.experimental import pallas as pl
from jax.experimental.pallas import tpu as pltpu

# Module hyper-parameters (from Photodetector.__init__ defaults).
RESPONSIVITY = 1.0
DARK_CURRENT = 1e-9          # NOTE: below f32 resolution for |I| >~ 1e-2 (same as torch f32)
THERMAL_NOISE = 1e-12
BANDWIDTH = 1e10
NOISE_STD = float(math.sqrt(THERMAL_NOISE * BANDWIDTH))  # 0.1

# Tiling parameters: lane-dense slab, ~1 MiB f32 tiles.
_LANES = 512            # multiple of 128 -> unmasked, lane-dense vector stores
_MAX_TILE_ROWS = 512    # 512 x 512 x 4 B = 1 MiB per f32 buffer


def _round_up(x: int, m: int) -> int:
    return ((x + m - 1) // m) * m


def _slab_geometry(n: int):
    """Lane-dense padded slab geometry for a flat length-n array."""
    rows = max(1, -(-n // _LANES))                       # ceil(n / _LANES)
    tile_rows = min(_MAX_TILE_ROWS, _round_up(rows, 8))  # (8,128)-aligned tile
    rows_padded = _round_up(rows, tile_rows)
    return rows_padded, tile_rows


def _pd_eval_kernel(x_ref, o_ref):
    # Elementwise hot path: |x|^2 * R + I_dark  (VPU work on one VMEM tile).
    x = x_ref[...].astype(jnp.float32)
    photocurrent = RESPONSIVITY * (x * x) + DARK_CURRENT
    o_ref[...] = photocurrent.astype(o_ref.dtype)


def _pd_train_kernel(x_ref, noise_ref, o_ref):
    # Eval path plus additive Gaussian thermal noise (standard-normal input,
    # scaled inside the kernel).
    x = x_ref[...].astype(jnp.float32)
    photocurrent = RESPONSIVITY * (x * x) + DARK_CURRENT
    thermal = noise_ref[...].astype(jnp.float32) * jnp.float32(NOISE_STD)
    o_ref[...] = (photocurrent + thermal).astype(o_ref.dtype)


@functools.partial(jax.jit, static_argnames=("training",))
def photodetector(optical_signal: jax.Array,
                  noise_key: jax.Array | None = None,
                  *,
                  training: bool = False) -> jax.Array:
    """Pallas Photodetector forward. optical_signal: [batch, n_wavelengths]."""
    # TODO(synk): real-valued optical fields only; complex amplitudes would need
    # re^2 + im^2 for |x|^2 (torch.abs on complex inputs).
    if jnp.iscomplexobj(optical_signal):
        raise NotImplementedError("photodetector kernel supports real inputs only")

    orig_shape = optical_signal.shape
    out_dtype = optical_signal.dtype

    # Flatten to a lane-dense (rows_padded, 512) slab, zero-padding the tail.
    flat = optical_signal.reshape(-1)
    n = flat.shape[0]
    rows_padded, tile_rows = _slab_geometry(n)
    padded_n = rows_padded * _LANES
    if padded_n != n:
        flat = jnp.pad(flat, (0, padded_n - n))
    slab = flat.reshape(rows_padded, _LANES)

    grid = (rows_padded // tile_rows,)
    def block():
        return pl.BlockSpec((tile_rows, _LANES), lambda i: (i, 0))
    out_shape = jax.ShapeDtypeStruct((rows_padded, _LANES), out_dtype)
    cparams = pltpu.CompilerParams(dimension_semantics=("parallel",))

    if not training:
        out_slab = pl.pallas_call(
            _pd_eval_kernel,
            out_shape=out_shape,
            grid=grid,
            in_specs=[block()],
            out_specs=block(),
            compiler_params=cparams,
        )(slab)
    else:
        if noise_key is None:
            noise_key = jax.random.PRNGKey(0)
        noise = jax.random.normal(noise_key, (rows_padded, _LANES), jnp.float32)
        out_slab = pl.pallas_call(
            _pd_train_kernel,
            out_shape=out_shape,
            grid=grid,
            in_specs=[block(), block()],
            out_specs=block(),
            compiler_params=cparams,
        )(slab, noise)

    return out_slab.reshape(-1)[:n].reshape(orig_shape)


if __name__ == "__main__":
    key = jax.random.PRNGKey(0)
    batch_size, n_wavelengths = 4, 16
    x = jax.random.normal(key, (batch_size, n_wavelengths), dtype=jnp.float32)

    # Eval mode (deterministic): check against a pure-JAX reference.
    out = photodetector(x, training=False)
    jax.block_until_ready(out)
    ref = RESPONSIVITY * jnp.abs(x) ** 2 + DARK_CURRENT
    assert out.shape == x.shape and out.dtype == x.dtype
    assert jnp.allclose(out, ref, rtol=1e-6, atol=1e-6), "eval mismatch vs reference"

    # Training mode (adds N(0, 0.1^2) thermal noise): exact check by
    # regenerating the same noise slab the wrapper uses.
    nkey = jax.random.PRNGKey(1234)
    out_train = photodetector(x, nkey, training=True)
    jax.block_until_ready(out_train)
    rows_padded, _ = _slab_geometry(x.size)
    noise_slab = jax.random.normal(nkey, (rows_padded, _LANES), jnp.float32)
    noise = noise_slab.reshape(-1)[: x.size].reshape(x.shape)
    ref_train = ref + noise * jnp.float32(NOISE_STD)
    assert out_train.shape == x.shape
    assert bool(jnp.all(jnp.isfinite(out_train)))
    assert jnp.allclose(out_train, ref_train, rtol=1e-6, atol=1e-6), "train mismatch"

    print("KERNEL_OK")
</pallas_src>

<mosaic_0001>
module attributes {stable_mosaic.version = 11 : i64} {
  func.func @_pd_eval_kernel(%arg0: i32, %arg1: memref<8x512xf32, #tpu.memory_space<vmem>>, %arg2: memref<8x512xf32, #tpu.memory_space<vmem>>) attributes {dimension_semantics = [#tpu.dimension_semantics<parallel>], iteration_bounds = array<i64: 1>, scalar_prefetch = 0 : i64, scratch_operands = 0 : i64, tpu.core_type = #tpu.core_type<tc>, window_params = [{transform_indices = @transform_0, window_bounds = array<i64: 8, 512>}, {transform_indices = @transform_1, window_bounds = array<i64: 8, 512>}]} {
    %c0 = arith.constant 0 : index
    %c0_0 = arith.constant 0 : index
    %0 = vector.load %arg1[%c0, %c0_0] : memref<8x512xf32, #tpu.memory_space<vmem>>, vector<8x512xf32>
    %1 = arith.mulf %0, %0 : vector<8x512xf32>
    %cst = arith.constant 1.000000e+00 : f32
    %2 = vector.broadcast %cst : f32 to vector<8x512xf32>
    %3 = arith.mulf %2, %1 : vector<8x512xf32>
    %cst_1 = arith.constant 9.99999971E-10 : f32
    %4 = vector.broadcast %cst_1 : f32 to vector<8x512xf32>
    %5 = arith.addf %3, %4 : vector<8x512xf32>
    %c0_2 = arith.constant 0 : index
    %c0_3 = arith.constant 0 : index
    %6 = vector.load %arg2[%c0_2, %c0_3] : memref<8x512xf32, #tpu.memory_space<vmem>>, vector<8x512xf32>
    tpu.vector_store %arg2[%c0_2, %c0_3], %5 {strides = array<i32>} : memref<8x512xf32, #tpu.memory_space<vmem>>, vector<8x512xf32>,
    return
  }
  func.func @transform_0(%arg0: i32) -> (i32, i32) {
    %c0_i32 = arith.constant 0 : i32
    %c0_i32_0 = arith.constant 0 : i32
    return %arg0, %c0_i32 : i32, i32
  }
  func.func @transform_1(%arg0: i32) -> (i32, i32) {
    %c0_i32 = arith.constant 0 : i32
    %c0_i32_0 = arith.constant 0 : i32
    return %arg0, %c0_i32 : i32, i32
  }
}

</mosaic_0001>

<bundles_post_ra>
// kernel: photodetector.1
= control target key start
LH: loop header
LB: loop body
LE: loop exit
PB: predicated region body
PF: predicated region fallthrough
CT: control target
= control target key end

     0   :  { %s62_s0 = inlined_call_operand.vmem [shape: f32[8,512], index: 0, kind: input, shape index: {}]   ;;  %s63_s1 = inlined_call_operand.vmem [shape: f32[8,512], index: 1, kind: output, shape index: {}]  }
   0x1   :  { %v8_v0 = vld [vmem:[%s62_s0] sm:$0xff]  ;;  %v9_v1 = vld [vmem:[%s62_s0 + $0x8] sm:$0xff]  ;;  %v10_v2 = vld [vmem:[%s62_s0 + $0x10] sm:$0xff] }
   0x2   :  { %v12_v3 = vmul.f32 %v8_v0, %v8_v0  ;;  %v13_v4 = vmul.f32 %v9_v1, %v9_v1  ;;  %v14_v5 = vmul.f32 %v10_v2, %v10_v2  ;;  %v11_v6 = vld [vmem:[%s62_s0 + $0x18] sm:$0xff] }
   0x3   :  { %v15_v7 = vmul.f32 %v11_v6, %v11_v6 }
   0x4   :  { %v16_v8 = vadd.f32 1e-09, %v12_v3  ;;  %v17_v9 = vadd.f32 1e-09, %v13_v4  ;;  %v18_v10 = vadd.f32 1e-09, %v14_v5 }
   0x5   :  { %v19_v11 = vadd.f32 1e-09, %v15_v7 }
   0x6   :  { %20 = vst [vmem:[%s63_s1] sm:$0xff] %v16_v8  ;;  %21 = vst [vmem:[%s63_s1 + $0x8] sm:$0xff] %v17_v9 }
   0x7   :  { %22 = vst [vmem:[%s63_s1 + $0x10] sm:$0xff] %v18_v10  ;;  %23 = vst [vmem:[%s63_s1 + $0x18] sm:$0xff] %v19_v11 }

</bundles_post_ra>
